<compile_context>
chip_gen: v6e
topology: v6e:2x2x1
jax: 0.10.0
libtpu: 0.0.40
codegen_flags: <defaults>
</compile_context>

<pallas_src>
import jax
import jax.numpy as jnp
from jax.experimental import pallas as pl
from jax.experimental.pallas import tpu as pltpu

_LANE = 128
_SUB = 8
_ROW_ALIGN = 32                    # block sublane count valid for f32/bf16/int8/bool
_TARGET_PAIR_BYTES = 12 << 20      # ~6 MiB per input block when dtypes match
_VMEM_LIMIT = 40 << 20             # 2 inputs x 2 buffers x 6 MiB = 24 MiB + slack


def _build_kernel(n_rows, tr, mask_dtype):
    """Kernel accumulating per-sample (pred>0, mask>thr, overlap) counts."""
    groups = tr // _SUB
    ragged = (n_rows % tr) != 0
    mask_is_bool = jnp.issubdtype(mask_dtype, jnp.bool_)
    mask_is_int = jnp.issubdtype(mask_dtype, jnp.integer)

    def kernel(p_ref, m_ref, out_ref):
        k = pl.program_id(1)

        @pl.when(k == 0)
        def _():
            out_ref[...] = jnp.zeros_like(out_ref)

        # Compare in native dtype (no whole-block upcast).
        # sigmoid(x) > 0.5  <=>  x > 0  (no transcendental needed).
        x = p_ref[0]                               # (tr, 128)
        y = m_ref[0]                               # (tr, 128)
        p = x > 0
        if mask_is_bool:
            t = y
        elif mask_is_int:
            t = y > 0                              # == (y > 0.5) for integers
        else:
            t = y > 0.5

        if ragged:
            # The final row-chunk reads past the padded row count; Pallas does
            # not zero-fill out-of-bounds block rows, so mask them explicitly.
            valid = n_rows - k * tr
            rows = jax.lax.broadcasted_iota(jnp.int32, (tr, _LANE), 0)
            inb = rows < valid
            p = jnp.logical_and(p, inb)
            t = jnp.logical_and(t, inb)

        o = jnp.logical_and(p, t)

        # Reduce only across 8-row groups (pure VPU adds); keep (8,128)
        # lane-dense partials resident in the output block.
        pf = p.astype(jnp.float32).reshape(groups, _SUB, _LANE)
        tf = t.astype(jnp.float32).reshape(groups, _SUB, _LANE)
        of = o.astype(jnp.float32).reshape(groups, _SUB, _LANE)

        out_ref[0, 0, :, :] += jnp.sum(pf, axis=0)
        out_ref[0, 1, :, :] += jnp.sum(tf, axis=0)
        out_ref[0, 2, :, :] += jnp.sum(of, axis=0)

    return kernel


@jax.jit
def dice_precision_recall(preds, mask):
    """Returns (dice_mean, precision_mean, recall_mean) as scalar f32 arrays."""
    N = preds.shape[0]
    p2 = preds.reshape(N, -1)
    m2 = mask.reshape(N, -1)       # keep native dtype (bool/int/bf16/f32)
    D = p2.shape[1]

    # Pad only up to a multiple of 8*128 = 1024 elements (no copy when already
    # aligned). Zero padding contributes nothing to any of the three sums.
    D_pad = -(-D // (_SUB * _LANE)) * (_SUB * _LANE)
    R = D_pad // _LANE

    def to_rows(x):
        if D_pad != D:
            x = jnp.pad(x, ((0, 0), (0, D_pad - D)))
        return x.reshape(N, R, _LANE)

    p3 = to_rows(p2)
    m3 = to_rows(m2)

    pair_bytes = p3.dtype.itemsize + m3.dtype.itemsize
    max_rows = max(_ROW_ALIGN,
                   (_TARGET_PAIR_BYTES // (_LANE * pair_bytes))
                   // _ROW_ALIGN * _ROW_ALIGN)
    tr = R if R <= max_rows else max_rows          # always a multiple of 8
    chunks = -(-R // tr)

    kernel = _build_kernel(R, tr, m3.dtype)

    out = pl.pallas_call(
        kernel,
        out_shape=jax.ShapeDtypeStruct((N, 3, _SUB, _LANE), jnp.float32),
        grid_spec=pltpu.PrefetchScalarGridSpec(
            num_scalar_prefetch=0,
            grid=(N, chunks),
            in_specs=[
                pl.BlockSpec((1, tr, _LANE), lambda i, k: (i, k, 0)),
                pl.BlockSpec((1, tr, _LANE), lambda i, k: (i, k, 0)),
            ],
            out_specs=pl.BlockSpec((1, 3, _SUB, _LANE),
                                   lambda i, k: (i, 0, 0, 0)),
        ),
        compiler_params=pltpu.CompilerParams(
            dimension_semantics=("parallel", "arbitrary"),
            vmem_limit_bytes=_VMEM_LIMIT),
        cost_estimate=pl.CostEstimate(
            flops=6 * N * D_pad,
            transcendentals=0,
            bytes_accessed=N * D_pad * pair_bytes + N * 3 * _SUB * _LANE * 4),
    )(p3, m3)

    sums = out.sum(axis=(2, 3))                    # (N, 3) tiny XLA reduce
    ps, ts, ov = sums[:, 0], sums[:, 1], sums[:, 2]
    eps = jnp.float32(0.0001)
    dice = 2.0 * ov / (ps + ts + eps)
    precision = ov / (ps + eps)
    recall = ov / (ts + eps)
    return dice.mean(), precision.mean(), recall.mean()


def _reference(preds, mask):
    N = preds.shape[0]
    p = (jax.nn.sigmoid(preds.reshape(N, -1)) > 0.5).astype(jnp.float32)
    t = (mask.reshape(N, -1) > 0.5).astype(jnp.float32)
    ps = p.sum(-1)
    ts = t.sum(-1)
    ov = (p * t).sum(-1)
    dice = 2 * ov / (ps + ts + 0.0001)
    recall = ov / (ts + 0.0001)
    precision = ov / (ps + 0.0001)
    return dice.mean(), precision.mean(), recall.mean()


if __name__ == "__main__":
    key = jax.random.PRNGKey(0)
    k1, k2 = jax.random.split(key)
    # Small shapes consistent with a segmentation head: (N, C, H, W)
    preds = jax.random.normal(k1, (2, 4, 16, 16), dtype=jnp.float32)   # logits
    mask = jax.random.uniform(k2, (2, 4, 16, 16), dtype=jnp.float32)   # soft mask

    dice, precision, recall = dice_precision_recall(preds, mask)
    jax.block_until_ready((dice, precision, recall))

    dice_r, prec_r, rec_r = _reference(preds, mask)
    assert jnp.allclose(dice, dice_r, atol=1e-5), (dice, dice_r)
    assert jnp.allclose(precision, prec_r, atol=1e-5), (precision, prec_r)
    assert jnp.allclose(recall, rec_r, atol=1e-5), (recall, rec_r)

    # Mirrors the torch module's (dice.mean().item(), precision..., recall...)
    _result = (float(dice), float(precision), float(recall))
    print("KERNEL_OK")
</pallas_src>

<mosaic_0001>
module attributes {stable_mosaic.version = 11 : i64} {
  func.func @kernel(%arg0: i32, %arg1: i32, %arg2: memref<1x8x128xf32, #tpu.memory_space<vmem>>, %arg3: memref<1x8x128xf32, #tpu.memory_space<vmem>>, %arg4: memref<1x3x8x128xf32, #tpu.memory_space<vmem>>) attributes {dimension_semantics = [#tpu.dimension_semantics<parallel>, #tpu.dimension_semantics<arbitrary>], iteration_bounds = array<i64: 2, 1>, scalar_prefetch = 0 : i64, scratch_operands = 0 : i64, tpu.core_type = #tpu.core_type<tc>, window_params = [{transform_indices = @transform_0, window_bounds = array<i64: 1, 8, 128>}, {transform_indices = @transform_1, window_bounds = array<i64: 1, 8, 128>}, {transform_indices = @transform_2, window_bounds = array<i64: 1, 3, 8, 128>}]} {
    %c0_i32 = arith.constant 0 : i32
    %0 = arith.cmpi eq, %arg1, %c0_i32 : i32
    %1 = arith.extui %0 : i1 to i32
    %c0_i32_0 = arith.constant 0 : i32
    %2 = arith.cmpi ne, %1, %c0_i32_0 : i32
    scf.if %2 {
      %cst_32 = arith.constant 0.000000e+00 : f32
      %42 = vector.broadcast %cst_32 : f32 to vector<1x3x8x128xf32>
      %c0_33 = arith.constant 0 : index
      %c0_34 = arith.constant 0 : index
      %c0_35 = arith.constant 0 : index
      %c0_36 = arith.constant 0 : index
      %43 = vector.load %arg4[%c0_33, %c0_34, %c0_35, %c0_36] : memref<1x3x8x128xf32, #tpu.memory_space<vmem>>, vector<1x3x8x128xf32>
      tpu.vector_store %arg4[%c0_33, %c0_34, %c0_35, %c0_36], %42 {strides = array<i32>} : memref<1x3x8x128xf32, #tpu.memory_space<vmem>>, vector<1x3x8x128xf32>,
    } else {
    }
    %c0 = arith.constant 0 : index
    %c0_1 = arith.constant 0 : index
    %c0_2 = arith.constant 0 : index
    %3 = vector.load %arg2[%c0, %c0_1, %c0_2] : memref<1x8x128xf32, #tpu.memory_space<vmem>>, vector<1x8x128xf32>
    %4 = vector.shape_cast %3 : vector<1x8x128xf32> to vector<8x128xf32>
    %c0_3 = arith.constant 0 : index
    %c0_4 = arith.constant 0 : index
    %c0_5 = arith.constant 0 : index
    %5 = vector.load %arg3[%c0_3, %c0_4, %c0_5] : memref<1x8x128xf32, #tpu.memory_space<vmem>>, vector<1x8x128xf32>
    %6 = vector.shape_cast %5 : vector<1x8x128xf32> to vector<8x128xf32>
    %cst = arith.constant 0.000000e+00 : f32
    %7 = vector.broadcast %cst : f32 to vector<8x128xf32>
    %8 = arith.cmpf ogt, %4, %7 : vector<8x128xf32>
    %cst_6 = arith.constant 5.000000e-01 : f32
    %9 = vector.broadcast %cst_6 : f32 to vector<8x128xf32>
    %10 = arith.cmpf ogt, %6, %9 : vector<8x128xf32>
    %11 = arith.andi %8, %10 : vector<8x128xi1>
    %12 = arith.extui %8 : vector<8x128xi1> to vector<8x128xi32>
    %13 = arith.sitofp %12 : vector<8x128xi32> to vector<8x128xf32>
    %14 = vector.shape_cast %13 : vector<8x128xf32> to vector<1x8x128xf32>
    %15 = arith.extui %10 : vector<8x128xi1> to vector<8x128xi32>
    %16 = arith.sitofp %15 : vector<8x128xi32> to vector<8x128xf32>
    %17 = vector.shape_cast %16 : vector<8x128xf32> to vector<1x8x128xf32>
    %18 = arith.extui %11 : vector<8x128xi1> to vector<8x128xi32>
    %19 = arith.sitofp %18 : vector<8x128xi32> to vector<8x128xf32>
    %20 = vector.shape_cast %19 : vector<8x128xf32> to vector<1x8x128xf32>
    %c0_7 = arith.constant 0 : index
    %c0_8 = arith.constant 0 : index
    %c0_9 = arith.constant 0 : index
    %c0_10 = arith.constant 0 : index
    %21 = vector.load %arg4[%c0_7, %c0_8, %c0_9, %c0_10] : memref<1x3x8x128xf32, #tpu.memory_space<vmem>>, vector<1x1x8x128xf32>
    %22 = vector.shape_cast %21 : vector<1x1x8x128xf32> to vector<8x128xf32>
    %cst_11 = arith.constant dense<0.000000e+00> : vector<8x128xf32>
    %23 = vector.multi_reduction <add>, %14, %cst_11 [0] : vector<1x8x128xf32> to vector<8x128xf32>
    %24 = arith.addf %22, %23 : vector<8x128xf32>
    %c0_12 = arith.constant 0 : index
    %c0_13 = arith.constant 0 : index
    %c0_14 = arith.constant 0 : index
    %c0_15 = arith.constant 0 : index
    %25 = vector.load %arg4[%c0_12, %c0_13, %c0_14, %c0_15] : memref<1x3x8x128xf32, #tpu.memory_space<vmem>>, vector<1x1x8x128xf32>
    %26 = vector.shape_cast %25 : vector<1x1x8x128xf32> to vector<8x128xf32>
    %27 = vector.shape_cast %24 : vector<8x128xf32> to vector<1x1x8x128xf32>
    tpu.vector_store %arg4[%c0_12, %c0_13, %c0_14, %c0_15], %27 {strides = array<i32>} : memref<1x3x8x128xf32, #tpu.memory_space<vmem>>, vector<1x1x8x128xf32>,
    %c0_16 = arith.constant 0 : index
    %c1 = arith.constant 1 : index
    %c0_17 = arith.constant 0 : index
    %c0_18 = arith.constant 0 : index
    %28 = vector.load %arg4[%c0_16, %c1, %c0_17, %c0_18] : memref<1x3x8x128xf32, #tpu.memory_space<vmem>>, vector<1x1x8x128xf32>
    %29 = vector.shape_cast %28 : vector<1x1x8x128xf32> to vector<8x128xf32>
    %cst_19 = arith.constant dense<0.000000e+00> : vector<8x128xf32>
    %30 = vector.multi_reduction <add>, %17, %cst_19 [0] : vector<1x8x128xf32> to vector<8x128xf32>
    %31 = arith.addf %29, %30 : vector<8x128xf32>
    %c0_20 = arith.constant 0 : index
    %c1_21 = arith.constant 1 : index
    %c0_22 = arith.constant 0 : index
    %c0_23 = arith.constant 0 : index
    %32 = vector.load %arg4[%c0_20, %c1_21, %c0_22, %c0_23] : memref<1x3x8x128xf32, #tpu.memory_space<vmem>>, vector<1x1x8x128xf32>
    %33 = vector.shape_cast %32 : vector<1x1x8x128xf32> to vector<8x128xf32>
    %34 = vector.shape_cast %31 : vector<8x128xf32> to vector<1x1x8x128xf32>
    tpu.vector_store %arg4[%c0_20, %c1_21, %c0_22, %c0_23], %34 {strides = array<i32>} : memref<1x3x8x128xf32, #tpu.memory_space<vmem>>, vector<1x1x8x128xf32>,
    %c0_24 = arith.constant 0 : index
    %c2 = arith.constant 2 : index
    %c0_25 = arith.constant 0 : index
    %c0_26 = arith.constant 0 : index
    %35 = vector.load %arg4[%c0_24, %c2, %c0_25, %c0_26] : memref<1x3x8x128xf32, #tpu.memory_space<vmem>>, vector<1x1x8x128xf32>
    %36 = vector.shape_cast %35 : vector<1x1x8x128xf32> to vector<8x128xf32>
    %cst_27 = arith.constant dense<0.000000e+00> : vector<8x128xf32>
    %37 = vector.multi_reduction <add>, %20, %cst_27 [0] : vector<1x8x128xf32> to vector<8x128xf32>
    %38 = arith.addf %36, %37 : vector<8x128xf32>
    %c0_28 = arith.constant 0 : index
    %c2_29 = arith.constant 2 : index
    %c0_30 = arith.constant 0 : index
    %c0_31 = arith.constant 0 : index
    %39 = vector.load %arg4[%c0_28, %c2_29, %c0_30, %c0_31] : memref<1x3x8x128xf32, #tpu.memory_space<vmem>>, vector<1x1x8x128xf32>
    %40 = vector.shape_cast %39 : vector<1x1x8x128xf32> to vector<8x128xf32>
    %41 = vector.shape_cast %38 : vector<8x128xf32> to vector<1x1x8x128xf32>
    tpu.vector_store %arg4[%c0_28, %c2_29, %c0_30, %c0_31], %41 {strides = array<i32>} : memref<1x3x8x128xf32, #tpu.memory_space<vmem>>, vector<1x1x8x128xf32>,
    return
  }
  func.func @transform_0(%arg0: i32, %arg1: i32) -> (i32, i32, i32) {
    %c0_i32 = arith.constant 0 : i32
    %c0_i32_0 = arith.constant 0 : i32
    return %arg0, %arg1, %c0_i32 : i32, i32, i32
  }
  func.func @transform_1(%arg0: i32, %arg1: i32) -> (i32, i32, i32) {
    %c0_i32 = arith.constant 0 : i32
    %c0_i32_0 = arith.constant 0 : i32
    return %arg0, %arg1, %c0_i32 : i32, i32, i32
  }
  func.func @transform_2(%arg0: i32, %arg1: i32) -> (i32, i32, i32, i32) {
    %c0_i32 = arith.constant 0 : i32
    %c0_i32_0 = arith.constant 0 : i32
    %c0_i32_1 = arith.constant 0 : i32
    %c0_i32_2 = arith.constant 0 : i32
    return %arg0, %c0_i32, %c0_i32_0, %c0_i32_1 : i32, i32, i32, i32
  }
}

</mosaic_0001>

<bundles_post_ra>
// kernel: dice_precision_recall.1
= control target key start
LH: loop header
LB: loop body
LE: loop exit
PB: predicated region body
PF: predicated region fallthrough
CT: control target
= control target key end

     0   :  { %s388_s9 = smov 0   ;;  %s390_s10 = smov 0   ;;  %s421_s0 = inlined_call_operand.vmem [shape: f32[2,8,128], index: 0, kind: input, shape index: {}]   ;;  %s422_s1 = inlined_call_operand.vmem [shape: f32[2,8,128], index: 1, kind: input, shape index: {}]   ;;  %s423_s2 = inlined_call_operand.vmem [shape: f32[2,3,8,128], index: 2, kind: output, shape index: {}]  }
   0x1   :  { %s392_s11 = smov 0  }
   0x2 LB: > { %s24_s12 = sadd.s32 1, %s366_s10  ;;  %p309_p0 = scmp.ge.s32.totalorder %s370_s11, 1  ;;  %s370_s11 = sphi %s392_s11, %s12_s11   ;;  %s366_s10 = sphi %s390_s10, %s425_s10   ;;  %s362_s9 = sphi %s388_s9, %s424_s9  }
   0x3   : > { %p26_p1 = scmp.ge.s32.totalorder %s24_s12, 2  ;;  %p142_p2 = scmp.lt.s32.totalorder %s370_s11, 3 }
   0x5   : > { %s427_s12 = smov (%p26_p1, %s24_s12), 0  ;;  %p143_p3 = pnand %p309_p0, %p142_p2 }
   0x6   : > { %p173_p4 = scmp.lt.s32.totalorder (!%p143_p3), %s362_s9, 1 }
   0x7   : > { %146 = sbr.rel (%p143_p3) target bundleno = 21 (0x15), region = 28 }
   0xc   : > { %s429_s9 = smov (!%p173_p4, %s362_s9), 1  ;;  %v372_v2 = vmov 0.0  }
   0xd   : > { %s322_s13 = smul.u32 24, %s429_s9  ;;  %s310_s14 = sshll.u32 %s429_s9, 3 }
   0xe   : > { %s179_s17 = scalar_lea.vmem %s421_s0, %s310_s14  ;;  %s186_s20 = scalar_lea.vmem %s422_s1, %s310_s14 }
   0xf   : > { %v199_v0 = vld [vmem:[%s179_s17] sm:$0xff]  ;;  %s191_s23 = scalar_lea.vmem %s423_s2, %s322_s13 }
  0x10   : > { %v200_v1 = vld [vmem:[%s186_s20] sm:$0xff]  ;;  %vm201_vm0 = vcmp.gt.f32.partialorder %v199_v0, 0.0 }
  0x11   : > { %vm202_vm1 = vcmp.gt.f32.partialorder %v200_v1, 0.5  ;;  %v313_v3 = vsel %vm201_vm0, 1.0, %v372_v2 }
  0x12   : > { %v314_v4 = vsel %vm202_vm1, 1.0, %v372_v2  ;;  %vm203_vm2 = vmand %vm201_vm0, %vm202_vm1  ;;  %213 = vst [vmem:[%s191_s23] sm:$0xff] %v313_v3 }
  0x13   : > { %v315_v5 = vsel %vm203_vm2, 1.0, %v372_v2  ;;  %317 = vst [vmem:[%s191_s23 + $0x8] sm:$0xff] %v314_v4 }
  0x14   : > { %319 = vst [vmem:[%s191_s23 + $0x10] sm:$0xff] %v315_v5 }
  0x15 PF: > { %s12_s11 = sadd.s32 1, %s370_s11   ;;  %s424_s9 = smov %s366_s10 }
  0x16   : > { %p9_p5 = scmp.ge.s32.totalorder %s12_s11, 4   ;;  %s425_s10 = smov %s427_s12 }
  0x18   :  { %11 = sbr.rel (!%p9_p5) target bundleno = 2 (0x2), region = 67 }

</bundles_post_ra>
